<compile_context>
chip_gen: v7x
topology: tpu7x:2x2x1
jax: 0.10.0
libtpu: 0.0.40
codegen_flags: <defaults>
</compile_context>

<pallas_src>
import jax
import jax.numpy as jnp
from jax.experimental import pallas as pl
from jax.experimental.pallas import tpu as pltpu


def _dma_identity_kernel(x_hbm, o_hbm, sem):
    # Single whole-array HBM -> HBM DMA.  No VMEM staging, no vld/vst.
    cp = pltpu.make_async_copy(x_hbm, o_hbm, sem)
    cp.start()
    cp.wait()


def _pallas_identity(x):
    """Materialize a fresh copy of `x` via one HBM->HBM DMA."""
    nbytes = int(x.size) * x.dtype.itemsize
    return pl.pallas_call(
        _dma_identity_kernel,
        out_shape=jax.ShapeDtypeStruct(x.shape, x.dtype),
        in_specs=[pl.BlockSpec(memory_space=pl.ANY)],
        out_specs=pl.BlockSpec(memory_space=pl.ANY),
        scratch_shapes=[pltpu.SemaphoreType.DMA(())],
        cost_estimate=pl.CostEstimate(
            flops=0, transcendentals=0, bytes_accessed=2 * nbytes),
    )(x)


def no_attention_forward(x, input_raw=None, mask=None, *, use_pallas=False):
    """Equivalent of NoAttention.forward: returns `input` unchanged.

    `input_raw` and `mask` are accepted for signature parity but unused,
    exactly as in the PyTorch module.

    Default (use_pallas=False): pure pass-through — the fastest correct
    implementation for an identity op (no HBM traffic, no launch).
    use_pallas=True: produce a fresh buffer via a single HBM->HBM DMA kernel
    (only useful if an explicit op boundary / distinct output is required).
    """
    del input_raw, mask

    if not use_pallas:
        return x

    # Bypass Pallas for degenerate / tiny inputs: launch + DMA setup overhead
    # dwarfs nanoseconds of data movement.
    if x.ndim == 0 or x.size == 0:
        return x

    return _pallas_identity(x)


if __name__ == "__main__":
    # Deterministic small shapes consistent with an attention-style input:
    # (batch, seq, hidden) = (2, 8, 32).
    batch, seq, hidden = 2, 8, 32

    key = jax.random.PRNGKey(0)
    k_x, k_raw, k_m = jax.random.split(key, 3)

    x = jax.random.normal(k_x, (batch, seq, hidden), dtype=jnp.float32)
    x_raw = jax.random.normal(k_raw, (batch, seq, hidden), dtype=jnp.float32)
    mask = (jax.random.uniform(k_m, (batch, seq)) > 0.5).astype(jnp.float32)

    # Default path: identical semantics to the PyTorch module (pass-through).
    out = no_attention_forward(x, x_raw, mask)
    out = jax.block_until_ready(out)
    assert out.shape == x.shape
    assert out.dtype == x.dtype
    assert bool(jnp.array_equal(out, x)), "pass-through mismatch vs input"

    # Exercise the Pallas HBM->HBM DMA kernel once and verify it as well.
    out_k = no_attention_forward(x, x_raw, mask, use_pallas=True)
    out_k = jax.block_until_ready(out_k)
    assert out_k.shape == x.shape
    assert out_k.dtype == x.dtype
    assert bool(jnp.array_equal(out_k, x)), "Pallas NoAttention mismatch vs input"

    print("KERNEL_OK")
</pallas_src>

<mosaic_0001>
module attributes {stable_mosaic.version = 11 : i64} {
  func.func @_dma_identity_kernel(%arg0: memref<2x8x32xf32, #tpu.memory_space<any>>, %arg1: memref<2x8x32xf32, #tpu.memory_space<any>>, %arg2: memref<!tpu.dma_semaphore, #tpu.memory_space<semaphore_mem>>) attributes {dimension_semantics = [], scalar_prefetch = 0 : i64, scratch_operands = 1 : i64, tpu.core_type = #tpu.core_type<tc>} {
    tpu.enqueue_dma source(%arg0 : memref<2x8x32xf32, #tpu.memory_space<any>>) target(%arg1 : memref<2x8x32xf32, #tpu.memory_space<any>>) target_semaphore(%arg2 : memref<!tpu.dma_semaphore, #tpu.memory_space<semaphore_mem>>)
    tpu.wait_dma2 semaphore(%arg2 : memref<!tpu.dma_semaphore, #tpu.memory_space<semaphore_mem>>) src(%arg0 : memref<2x8x32xf32, #tpu.memory_space<any>>) dst(%arg1 : memref<2x8x32xf32, #tpu.memory_space<any>>)
    return
  }
}

</mosaic_0001>

<bundles_post_ra>
// kernel: tpu_custom_call.1
= control target key start
LH: loop header
LB: loop body
LE: loop exit
PB: predicated region body
PF: predicated region fallthrough
CT: control target
= control target key end

     0   :  { %s35_s6 = smov [#allocation2]   ;;  %s36_s7 = smov [#allocation3]   ;;  %s54_s0 = inlined_call_operand.hbm [shape: f32[2,8,32], index: 0, kind: input, shape index: {}]   ;;  %s55_s1 = inlined_call_operand.hbm [shape: f32[2,8,32], index: 1, kind: output, shape index: {}]  }
   0x1   :  { %s37_s8 = smov 0  }
   0x2   :  { %18 = dma.general %s54_s0, 256, %s55_s1, %s35_s6, %s36_s7, [#allocation4], %s37_s8, 0  }
   0x3   :  { %33 = dma.done.wait [#allocation2], 256 }
   0x4   :  { %34 = vsyncadd [#allocation2], 4294967040 }
   0x5   :  { %23 = vsyncmov [#allocation2] }
   0x8   :  { %s24_s13 = vpop.sfrf %23 }
   0x9   :  { %p29_p0 = scmp.ne.s32.totalorder %s24_s13, 0 }
   0xb   :  { %28 = shalt.err (%p29_p0)  }

</bundles_post_ra>
